<compile_context>
chip_gen: v5e
topology: v5e:2x2
jax: 0.10.0
libtpu: 0.0.40
codegen_flags: <defaults>
</compile_context>

<pallas_src>
import functools

import jax
import jax.numpy as jnp
from jax.experimental import pallas as pl
from jax.experimental.pallas import tpu as pltpu


_MAX_LANE = 8192
# ~2 MiB per block: amortizes the ~0.35 us per-grid-step overhead (measured
# HBM-roofline curve flattens around 1-2 MiB tiles) while keeping the
# 2*(in + out) double-buffers within every generation's default scoped VMEM.
_TARGET_BLOCK_BYTES = 2 * 1024 * 1024


def _apply_activation(s, activation):
    if activation == "relu":
        return jnp.maximum(s, 0.0)
    elif activation == "leaky_relu":
        return jnp.where(s > 0, s, 0.01 * s)
    elif activation == "selu":
        alpha = 1.6732632423543772
        scale = 1.0507009873554805
        return scale * jnp.where(s > 0, s, alpha * (jnp.exp(s) - 1.0))
    elif activation == "none":
        return s
    else:
        raise ValueError(f"unknown activation: {activation}")


def _residual_block_kernel(x_ref, o_ref, *, activation):
    x = x_ref[...].astype(jnp.float32)
    s = x + x  # x += residual; residual == x (Identity blocks / Identity shortcut)
    o_ref[...] = _apply_activation(s, activation).astype(o_ref.dtype)


def _run_2d(x2d, activation, block_rows, lane):
    rows = x2d.shape[0]
    grid = (pl.cdiv(rows, block_rows),)
    return pl.pallas_call(
        functools.partial(_residual_block_kernel, activation=activation),
        out_shape=jax.ShapeDtypeStruct((rows, lane), x2d.dtype),
        grid_spec=pltpu.PrefetchScalarGridSpec(
            num_scalar_prefetch=0,
            grid=grid,
            in_specs=[pl.BlockSpec((block_rows, lane), lambda i: (i, 0))],
            out_specs=pl.BlockSpec((block_rows, lane), lambda i: (i, 0)),
        ),
        compiler_params=pltpu.CompilerParams(
            dimension_semantics=("parallel",)),
        # NOTE: input_output_aliases={0: 0} would be valid here (shapes match),
        # but only pays off if the caller donates x; left off to avoid XLA
        # inserting a defensive copy for non-donated inputs.
    )(x2d)


def _pick_lane(total):
    # Widest multiple of 128 (<= _MAX_LANE) that divides the element count,
    # so the slab reshape is free (no padding copy needed).
    for k in range(_MAX_LANE // 128, 0, -1):
        lane = 128 * k
        if total % lane == 0:
            return lane
    return None


def residual_block(x, in_channels, out_channels, activation="relu"):
    """Pallas implementation of ResidualBlock.forward for NCHW input x."""
    assert x.shape[1] == in_channels
    orig_shape = x.shape
    total = x.size
    itemsize = jnp.dtype(x.dtype).itemsize

    lane = _pick_lane(total)
    if lane is None:
        # Rare fallback for odd sizes: minimal zero-pad to a lane multiple.
        lane = 1024 if total >= 1024 else 128
        pad = (-total) % lane
        x_flat = jnp.pad(x.reshape(-1), (0, pad))
    else:
        pad = 0
        x_flat = x.reshape(-1)

    rows = x_flat.size // lane
    x2d = x_flat.reshape(rows, lane)

    # ~2 MiB blocks; row count a multiple of 32 so f32/bf16/int8 layouts are
    # all legal.  If the whole slab is smaller than one block, use a single
    # full-extent block (always layout-legal since it equals the array dims).
    block_rows = max(32, ((_TARGET_BLOCK_BYTES // (lane * itemsize)) // 32) * 32)
    if block_rows >= rows:
        block_rows = rows

    out2d = _run_2d(x2d, activation, block_rows, lane)

    out_flat = out2d.reshape(-1)
    if pad:
        out_flat = out_flat[:total]
    return out_flat.reshape(orig_shape)


def residual_block_ref(x, activation="relu"):
    s = x.astype(jnp.float32) + x.astype(jnp.float32)
    return _apply_activation(s, activation).astype(x.dtype)


if __name__ == "__main__":
    key = jax.random.PRNGKey(0)

    # Main check: shape/dtype matching the PyTorch module's typical use.
    N, C, H, W = 2, 4, 16, 16
    x = jax.random.normal(key, (N, C, H, W), dtype=jnp.float32)
    out = residual_block(x, in_channels=C, out_channels=C, activation="relu")
    out = jax.block_until_ready(out)
    ref = residual_block_ref(x, activation="relu")
    assert out.shape == x.shape and out.dtype == x.dtype
    assert jnp.allclose(out, ref, atol=1e-6, rtol=1e-6)

    # bfloat16 activations + leaky_relu.
    xb = jax.random.normal(jax.random.PRNGKey(1), (2, 8, 16, 16),
                           dtype=jnp.bfloat16)
    outb = residual_block(xb, in_channels=8, out_channels=8,
                          activation="leaky_relu")
    outb = jax.block_until_ready(outb)
    refb = residual_block_ref(xb, activation="leaky_relu")
    assert outb.shape == xb.shape and outb.dtype == xb.dtype
    assert jnp.allclose(outb.astype(jnp.float32), refb.astype(jnp.float32),
                        atol=1e-2, rtol=1e-2)

    # selu path with mismatched channels (shortcut is Identity -> same math).
    xs = jax.random.normal(jax.random.PRNGKey(2), (2, 4, 16, 16),
                           dtype=jnp.float32)
    outs = residual_block(xs, in_channels=4, out_channels=8, activation="selu")
    outs = jax.block_until_ready(outs)
    refs = residual_block_ref(xs, activation="selu")
    assert jnp.allclose(outs, refs, atol=1e-5, rtol=1e-5)

    print("KERNEL_OK")
</pallas_src>

<mosaic_0001>
module attributes {stable_mosaic.version = 11 : i64} {
  func.func @_residual_block_kernel(%arg0: i32, %arg1: memref<1x2048xf32, #tpu.memory_space<vmem>>, %arg2: memref<1x2048xf32, #tpu.memory_space<vmem>>) attributes {dimension_semantics = [#tpu.dimension_semantics<parallel>], iteration_bounds = array<i64: 1>, scalar_prefetch = 0 : i64, scratch_operands = 0 : i64, tpu.core_type = #tpu.core_type<tc>, window_params = [{transform_indices = @transform_0, window_bounds = array<i64: 1, 2048>}, {transform_indices = @transform_1, window_bounds = array<i64: 1, 2048>}]} {
    %c0 = arith.constant 0 : index
    %c0_0 = arith.constant 0 : index
    %0 = vector.load %arg1[%c0, %c0_0] : memref<1x2048xf32, #tpu.memory_space<vmem>>, vector<1x2048xf32>
    %1 = arith.addf %0, %0 : vector<1x2048xf32>
    %cst = arith.constant 0.000000e+00 : f32
    %2 = vector.broadcast %cst : f32 to vector<1x2048xf32>
    %3 = arith.maximumf %1, %2 : vector<1x2048xf32>
    %c0_1 = arith.constant 0 : index
    %c0_2 = arith.constant 0 : index
    %4 = vector.load %arg2[%c0_1, %c0_2] : memref<1x2048xf32, #tpu.memory_space<vmem>>, vector<1x2048xf32>
    tpu.vector_store %arg2[%c0_1, %c0_2], %3 {strides = array<i32>} : memref<1x2048xf32, #tpu.memory_space<vmem>>, vector<1x2048xf32>,
    return
  }
  func.func @transform_0(%arg0: i32) -> (i32, i32) {
    %c0_i32 = arith.constant 0 : i32
    %c0_i32_0 = arith.constant 0 : i32
    return %arg0, %c0_i32 : i32, i32
  }
  func.func @transform_1(%arg0: i32) -> (i32, i32) {
    %c0_i32 = arith.constant 0 : i32
    %c0_i32_0 = arith.constant 0 : i32
    return %arg0, %c0_i32 : i32, i32
  }
}

</mosaic_0001>

<bundles_post_ra>
// kernel: tpu_custom_call.1
= control target key start
LH: loop header
LB: loop body
LE: loop exit
PB: predicated region body
PF: predicated region fallthrough
CT: control target
= control target key end

     0   :  { %6 = vsyncpa [#allocation3], 0  ;;  %s120_s0 = inlined_call_operand.hbm [shape: f32[1,2048], index: 0, kind: input, shape index: {}]   ;;  %s121_s1 = inlined_call_operand.hbm [shape: f32[1,2048], index: 1, kind: output, shape index: {}]  }
   0x1   :  { %7 = vsyncpa [#allocation4], 0  ;;  %s13_s8 = sshll.u32 %s120_s0, 4  ;;  %s102_s9 = smov [#allocation2]   ;;  %s14_s8 = int_to_ptr.hbm [resolvable:$true] %s13_s8 }
   0x2   :  { %s15_s10 = sshll.u32 %s102_s9, 4  ;;  %s16_s10 = int_to_ptr.vmem [resolvable:$true] %s15_s10 }
   0x3   :  { %18 = dma.hbm_to_vmem [thread:$0]  %s14_s8, 256, %s16_s10, [#allocation3]  }
   0x4   :  { %98 = dma.done.wait [#allocation3], 256  }
   0x5   :  { %99 = vsyncadd [#allocation3], 4294967040  ;;  %v23_v0 = vld [vmem:[#allocation2] sm:$0xff]  ;;  %v24_v1 = vld [vmem:[#allocation2 + $0x8] sm:$0xff]  ;;  %s103_s11 = smov [#allocation5]   ;;  %s38_s15 = sshll.u32 %s121_s1, 4  ;;  %s39_s15 = int_to_ptr.hbm [resolvable:$true] %s38_s15 }
   0x6   :  { %v25_v2 = vadd.f32 %v23_v0, %v23_v0  ;;  %v26_v3 = vadd.f32 %v24_v1, %v24_v1  ;;  %s36_s12 = sshll.u32 %s103_s11, 4  ;;  %s37_s12 = int_to_ptr.vmem [resolvable:$true] %s36_s12 }
   0x8   :  { %v27_v4 = vmax.f32 %v25_v2, 0.0  ;;  %v28_v5 = vmax.f32 %v26_v3, 0.0 }
   0xa   :  { %29 = vst [vmem:[#allocation5] sm:$0xff] %v27_v4 }
   0xb   :  { %30 = vst [vmem:[#allocation5 + $0x8] sm:$0xff] %v28_v5 }
   0xc   :  { %41 = dma.vmem_to_hbm [thread:$0]  %s37_s12, 256, %s39_s15, [#allocation4]  }
   0xd   :  { %100 = dma.done.wait [#allocation4], 256  }
   0xe   :  { %101 = vsyncadd [#allocation4], 4294967040 }
   0xf   :  { %46 = vsyncpa [#allocation3], 1 }
  0x10   :  { %47 = vsyncpa [#allocation4], 1 }

</bundles_post_ra>
